<compile_context>
chip_gen: v7x
topology: tpu7x:2x2x1
jax: 0.10.0
libtpu: 0.0.40
codegen_flags: <defaults>
</compile_context>

<pallas_src>
import functools

import jax
import jax.numpy as jnp
from jax.experimental import pallas as pl
from jax.experimental.pallas import tpu as pltpu


# ----------------------------------------------------------------------------
# Pallas kernels
# ----------------------------------------------------------------------------
def _encoder_kernel(x_ref, pt0_ref, pt1_ref, w1_ref, b1_ref, w2_ref, b2_ref,
                    f1_ref, f2_ref):
    """Fused encoder: pool -> 1x1 conv -> relu -> pool -> 1x1 conv -> relu.

    Activations are (C, N) with the flattened spatial axis N on lanes.
    avg-pooling is a right-multiply by a precomputed (N_in, N_out) matrix.
    """
    e1 = jnp.dot(x_ref[...], pt0_ref[...], preferred_element_type=jnp.float32)    # (C,  N1)
    f1 = jnp.dot(w1_ref[...], e1, preferred_element_type=jnp.float32) + b1_ref[...]
    f1 = jnp.maximum(f1, 0.0)                                                      # (c1, N1)
    f1_ref[...] = f1
    e2 = jnp.dot(f1, pt1_ref[...], preferred_element_type=jnp.float32)             # (c1, N2)
    f2 = jnp.dot(w2_ref[...], e2, preferred_element_type=jnp.float32) + b2_ref[...]
    f2_ref[...] = jnp.maximum(f2, 0.0)                                             # (c2, N2)


def _mc_pass_kernel(f1_ref, f2_ref, ut_ref, wup_ref, bup_ref, wd_ref, bd_ref,
                    wreg_ref, breg_ref, u1_ref, u2_ref, o_ref, *,
                    rate, dmin, dmax):
    """One MC pass: dropout(encoder feats) -> decoder -> regression head."""
    inv_keep = jnp.float32(1.0 / (1.0 - rate))
    keep1 = (u1_ref[...] >= jnp.float32(rate)).astype(jnp.float32)
    keep2 = (u2_ref[...] >= jnp.float32(rate)).astype(jnp.float32)
    f1d = f1_ref[...] * keep1 * inv_keep                                           # (c1, N1)
    f2d = f2_ref[...] * keep2 * inv_keep                                           # (c2, N2)

    # decoder: nearest upsample (matmul by Ut) -> project -> fuse skip -> mix
    up = jnp.dot(f2d, ut_ref[...], preferred_element_type=jnp.float32)             # (c2, N1)
    upp = jnp.dot(wup_ref[...], up, preferred_element_type=jnp.float32) + bup_ref[...]
    upp = jnp.maximum(upp, 0.0)                                                    # (dec,N1)
    fused = upp + f1d
    dec = jnp.dot(wd_ref[...], fused, preferred_element_type=jnp.float32) + bd_ref[...]
    dec = jnp.maximum(dec, 0.0)                                                    # (dec,N1)

    # regression head (direct mode): 1x1 conv -> depth-range-scaled sigmoid.
    # Output is (1, N1): lane-dense store (N1 on lanes), not a (N1, 1) vst.msk.
    z = jnp.dot(wreg_ref[...], dec, preferred_element_type=jnp.float32) + breg_ref[...]
    depth = jnp.float32(dmin) + jnp.float32(dmax - dmin) * jax.nn.sigmoid(z)
    o_ref[...] = depth.astype(o_ref.dtype)


# ----------------------------------------------------------------------------
# pallas_call wrappers
# ----------------------------------------------------------------------------
def pallas_encoder(x_t, pt0, pt1, w1t, b1, w2t, b2):
    """Run the deterministic encoder once. Returns f1 (c1, N1), f2 (c2, N2)."""
    c1, n1 = w1t.shape[0], pt0.shape[1]
    c2, n2 = w2t.shape[0], pt1.shape[1]
    return pl.pallas_call(
        _encoder_kernel,
        out_shape=(jax.ShapeDtypeStruct((c1, n1), jnp.float32),
                   jax.ShapeDtypeStruct((c2, n2), jnp.float32)),
    )(x_t, pt0, pt1, w1t, b1, w2t, b2)


def pallas_mc_passes(f1, f2, ut, wup, bup, wd, bd, wreg, breg, u1, u2, *,
                     rate, dmin, dmax, fw_pass):
    """Fused dropout+decoder+head, grid over MC passes (parallel axis)."""
    c1, n1 = f1.shape
    c2, n2 = f2.shape

    def _full(shape):
        # pass-invariant operand: same block every grid step (DMA'd once)
        return pl.BlockSpec(shape, lambda p, _n=len(shape): (0,) * _n)

    kern = functools.partial(_mc_pass_kernel, rate=rate, dmin=dmin, dmax=dmax)
    return pl.pallas_call(
        kern,
        out_shape=jax.ShapeDtypeStruct((fw_pass, 1, n1), jnp.float32),
        grid=(fw_pass,),
        in_specs=[
            _full(f1.shape), _full(f2.shape), _full(ut.shape),
            _full(wup.shape), _full(bup.shape),
            _full(wd.shape), _full(bd.shape),
            _full(wreg.shape), _full(breg.shape),
            pl.BlockSpec((None, c1, n1), lambda p: (p, 0, 0)),   # per-pass mask bits
            pl.BlockSpec((None, c2, n2), lambda p: (p, 0, 0)),
        ],
        out_specs=pl.BlockSpec((None, 1, n1), lambda p: (p, 0, 0)),
        compiler_params=pltpu.CompilerParams(
            dimension_semantics=("parallel",)),
    )(f1, f2, ut, wup, bup, wd, bd, wreg, breg, u1, u2)


# ----------------------------------------------------------------------------
# Pool / upsample operators and parameter init (host-side, built once)
# ----------------------------------------------------------------------------
def build_pool_t(B, H, W):
    """2x2 average pool (B,H,W)->(B,H/2,W/2) as right-multiply matrix.

    Returns Pt of shape (B*H*W, B*(H/2)*(W/2)): pooled = act(C, N_in) @ Pt.
    """
    H2, W2 = H // 2, W // 2
    n_in, n_out = B * H * W, B * H2 * W2
    b, i, j = jnp.meshgrid(jnp.arange(B), jnp.arange(H), jnp.arange(W),
                           indexing="ij")
    dst = ((b * H2 + i // 2) * W2 + j // 2).reshape(-1)
    return jnp.zeros((n_in, n_out), jnp.float32).at[
        jnp.arange(n_in), dst].set(0.25)


def build_upsample_t(B, H, W):
    """Nearest 2x upsample (B,H,W)->(B,2H,2W) as right-multiply matrix.

    Returns Ut of shape (B*H*W, B*2H*2W): up = act(C, N_in) @ Ut.
    """
    # TODO(synk): original SimpleDecoder may use bilinear upsampling; nearest
    #             is used for the synthetic decoder stage.
    H2, W2 = 2 * H, 2 * W
    n_in, n_out = B * H * W, B * H2 * W2
    b, i, j = jnp.meshgrid(jnp.arange(B), jnp.arange(H2), jnp.arange(W2),
                           indexing="ij")
    src = ((b * H + i // 2) * W + j // 2).reshape(-1)
    return jnp.zeros((n_in, n_out), jnp.float32).at[
        src, jnp.arange(n_out)].set(1.0)


def dict_stack(xs, exception="scales"):
    out = {}
    for k in xs[0].keys():
        if k == exception:
            out[k] = xs[0][k]
        else:
            out[k] = jnp.stack([x[k] for x in xs])
    return out


def init_params(key, c_in=4, c1=16, c2=32, dec_feat=16):
    ks = jax.random.split(key, 5)

    def lin(k, cin, cout):
        w = jax.random.normal(k, (cin, cout), jnp.float32) / jnp.sqrt(cin)
        b = jnp.zeros((cout,), jnp.float32)
        return w, b

    p = {}
    p["enc1_w"], p["enc1_b"] = lin(ks[0], c_in, c1)
    p["enc2_w"], p["enc2_b"] = lin(ks[1], c1, c2)
    p["dec_up_w"], p["dec_up_b"] = lin(ks[2], c2, dec_feat)
    p["dec_fuse_w"], p["dec_fuse_b"] = lin(ks[3], dec_feat, dec_feat)
    p["reg_w"], p["reg_b"] = lin(ks[4], dec_feat, 1)
    return p


# ----------------------------------------------------------------------------
# MC-dropout forward (encoder once, fw_pass stochastic passes, stacked)
# ----------------------------------------------------------------------------
def mc_dropout_forward(params, x_nchw, key, drop_rate=0.3, fw_pass=3,
                       depth_range=(0.1, 10.0)):
    B, C, H, W = x_nchw.shape
    H2, W2, H4, W4 = H // 2, W // 2, H // 4, W // 4
    n1, n2 = B * H2 * W2, B * H4 * W4
    c1 = params["enc1_w"].shape[1]
    c2 = params["enc2_w"].shape[1]

    # channels-on-sublanes / spatial-on-lanes layout: (C, B*H*W)
    x_t = jnp.transpose(x_nchw, (1, 0, 2, 3)).reshape(C, B * H * W)

    pt0 = build_pool_t(B, H, W)        # (B*H*W,   n1)
    pt1 = build_pool_t(B, H2, W2)      # (n1,      n2)
    ut = build_upsample_t(B, H4, W4)   # (n2,      n1)

    # transposed weights / column biases for the (C, N) layout
    w1t = params["enc1_w"].T;     b1 = params["enc1_b"].reshape(-1, 1)
    w2t = params["enc2_w"].T;     b2 = params["enc2_b"].reshape(-1, 1)
    wupt = params["dec_up_w"].T;  bup = params["dec_up_b"].reshape(-1, 1)
    wdt = params["dec_fuse_w"].T; bd = params["dec_fuse_b"].reshape(-1, 1)
    wregt = params["reg_w"].T;    breg = params["reg_b"].reshape(-1, 1)

    # ---- encoder: deterministic, hoisted out of the fw_pass loop, one call --
    f1, f2 = pallas_encoder(x_t, pt0, pt1, w1t, b1, w2t, b2)

    # ---- per-pass MC dropout masks (host-side RNG; fresh mask every pass) ---
    u1 = jax.random.uniform(jax.random.fold_in(key, 1), (fw_pass, c1, n1),
                            jnp.float32)
    u2 = jax.random.uniform(jax.random.fold_in(key, 2), (fw_pass, c2, n2),
                            jnp.float32)

    # ---- fused dropout + decoder + regression head, one call, grid=fw_pass --
    depth = pallas_mc_passes(f1, f2, ut, wupt, bup, wdt, bd, wregt, breg,
                             u1, u2, rate=drop_rate,
                             dmin=depth_range[0], dmax=depth_range[1],
                             fw_pass=fw_pass)                      # (fw_pass, 1, n1)

    pred = depth.reshape(fw_pass, B, H2, W2)[:, :, None, :, :]     # NCHW per pass
    preds = [{"pred": pred[p]} for p in range(fw_pass)]
    return dict_stack(preds, exception="scales")


# ----------------------------------------------------------------------------
if __name__ == "__main__":
    key = jax.random.PRNGKey(0)
    kx, kp, kd = jax.random.split(key, 3)
    x = jax.random.normal(kx, (2, 4, 16, 16), dtype=jnp.float32)   # NCHW input
    params = init_params(kp, c_in=4)

    out = mc_dropout_forward(params, x, kd, drop_rate=0.3, fw_pass=3)
    out = jax.block_until_ready(out)

    assert out["pred"].shape == (3, 2, 1, 8, 8), out["pred"].shape
    assert bool(jnp.all(jnp.isfinite(out["pred"])))
    # MC dropout: the fw_pass stochastic passes should not all be identical.
    assert bool(jnp.any(out["pred"][0] != out["pred"][1]))
    # depth must respect the sigmoid-scaled depth range
    assert bool(jnp.all(out["pred"] >= 0.1)) and bool(jnp.all(out["pred"] <= 10.0))
    print("KERNEL_OK")
</pallas_src>

<mosaic_0001>
module attributes {stable_mosaic.version = 11 : i64} {
  func.func @_encoder_kernel(%arg0: memref<4x512xf32, #tpu.memory_space<vmem>>, %arg1: memref<512x128xf32, #tpu.memory_space<vmem>>, %arg2: memref<128x32xf32, #tpu.memory_space<vmem>>, %arg3: memref<16x4xf32, #tpu.memory_space<vmem>>, %arg4: memref<16x1xf32, #tpu.memory_space<vmem>>, %arg5: memref<32x16xf32, #tpu.memory_space<vmem>>, %arg6: memref<32x1xf32, #tpu.memory_space<vmem>>, %arg7: memref<16x128xf32, #tpu.memory_space<vmem>>, %arg8: memref<32x32xf32, #tpu.memory_space<vmem>>) attributes {dimension_semantics = [], scalar_prefetch = 0 : i64, scratch_operands = 0 : i64, tpu.core_type = #tpu.core_type<tc>} {
    %c0 = arith.constant 0 : index
    %c0_0 = arith.constant 0 : index
    %0 = vector.load %arg0[%c0, %c0_0] : memref<4x512xf32, #tpu.memory_space<vmem>>, vector<4x512xf32>
    %c0_1 = arith.constant 0 : index
    %c0_2 = arith.constant 0 : index
    %1 = vector.load %arg1[%c0_1, %c0_2] : memref<512x128xf32, #tpu.memory_space<vmem>>, vector<512x128xf32>
    %cst = arith.constant dense<0.000000e+00> : vector<4x128xf32>
    %2 = tpu.matmul %0, %1, %cst {dimension_numbers = #tpu.dot_dimension_numbers<[1], [0], [0], [1], [0, 0, 1, 1], [], []>} : vector<4x512xf32>, vector<512x128xf32>, vector<4x128xf32> -> vector<4x128xf32>
    %c0_3 = arith.constant 0 : index
    %c0_4 = arith.constant 0 : index
    %3 = vector.load %arg3[%c0_3, %c0_4] : memref<16x4xf32, #tpu.memory_space<vmem>>, vector<16x4xf32>
    %cst_5 = arith.constant dense<0.000000e+00> : vector<16x128xf32>
    %4 = tpu.matmul %3, %2, %cst_5 {dimension_numbers = #tpu.dot_dimension_numbers<[1], [0], [0], [1], [0, 0, 1, 1], [], []>} : vector<16x4xf32>, vector<4x128xf32>, vector<16x128xf32> -> vector<16x128xf32>
    %c0_6 = arith.constant 0 : index
    %c0_7 = arith.constant 0 : index
    %5 = vector.load %arg4[%c0_6, %c0_7] : memref<16x1xf32, #tpu.memory_space<vmem>>, vector<16x1xf32>
    %6 = vector.broadcast %5 : vector<16x1xf32> to vector<16x128xf32>
    %7 = arith.addf %4, %6 : vector<16x128xf32>
    %cst_8 = arith.constant 0.000000e+00 : f32
    %8 = vector.broadcast %cst_8 : f32 to vector<16x128xf32>
    %9 = arith.maximumf %7, %8 : vector<16x128xf32>
    %c0_9 = arith.constant 0 : index
    %c0_10 = arith.constant 0 : index
    %10 = vector.load %arg7[%c0_9, %c0_10] : memref<16x128xf32, #tpu.memory_space<vmem>>, vector<16x128xf32>
    tpu.vector_store %arg7[%c0_9, %c0_10], %9 {strides = array<i32>} : memref<16x128xf32, #tpu.memory_space<vmem>>, vector<16x128xf32>,
    %c0_11 = arith.constant 0 : index
    %c0_12 = arith.constant 0 : index
    %11 = vector.load %arg2[%c0_11, %c0_12] : memref<128x32xf32, #tpu.memory_space<vmem>>, vector<128x32xf32>
    %cst_13 = arith.constant dense<0.000000e+00> : vector<16x32xf32>
    %12 = tpu.matmul %9, %11, %cst_13 {dimension_numbers = #tpu.dot_dimension_numbers<[1], [0], [0], [1], [0, 0, 1, 1], [], []>} : vector<16x128xf32>, vector<128x32xf32>, vector<16x32xf32> -> vector<16x32xf32>
    %c0_14 = arith.constant 0 : index
    %c0_15 = arith.constant 0 : index
    %13 = vector.load %arg5[%c0_14, %c0_15] : memref<32x16xf32, #tpu.memory_space<vmem>>, vector<32x16xf32>
    %cst_16 = arith.constant dense<0.000000e+00> : vector<32x32xf32>
    %14 = tpu.matmul %13, %12, %cst_16 {dimension_numbers = #tpu.dot_dimension_numbers<[1], [0], [0], [1], [0, 0, 1, 1], [], []>} : vector<32x16xf32>, vector<16x32xf32>, vector<32x32xf32> -> vector<32x32xf32>
    %c0_17 = arith.constant 0 : index
    %c0_18 = arith.constant 0 : index
    %15 = vector.load %arg6[%c0_17, %c0_18] : memref<32x1xf32, #tpu.memory_space<vmem>>, vector<32x1xf32>
    %16 = vector.broadcast %15 : vector<32x1xf32> to vector<32x32xf32>
    %17 = arith.addf %14, %16 : vector<32x32xf32>
    %cst_19 = arith.constant 0.000000e+00 : f32
    %18 = vector.broadcast %cst_19 : f32 to vector<32x32xf32>
    %19 = arith.maximumf %17, %18 : vector<32x32xf32>
    %c0_20 = arith.constant 0 : index
    %c0_21 = arith.constant 0 : index
    %20 = vector.load %arg8[%c0_20, %c0_21] : memref<32x32xf32, #tpu.memory_space<vmem>>, vector<32x32xf32>
    tpu.vector_store %arg8[%c0_20, %c0_21], %19 {strides = array<i32>} : memref<32x32xf32, #tpu.memory_space<vmem>>, vector<32x32xf32>,
    return
  }
}

</mosaic_0001>

<bundles_post_ra>
// kernel: tpu_custom_call.1
= control target key start
LH: loop header
LB: loop body
LE: loop exit
PB: predicated region body
PF: predicated region fallthrough
CT: control target
= control target key end

     0   :  { %14 = vsyncpa [#allocation3], 0  ;;  %s1151_s0 = inlined_call_operand.vmem [shape: f32[4,512], index: 0, kind: input, shape index: {}]   ;;  %s1152_s1 = inlined_call_operand.hbm [shape: f32[512,128], index: 1, kind: input, shape index: {}]   ;;  %s1153_s2 = inlined_call_operand.vmem [shape: f32[128,32], index: 2, kind: input, shape index: {}]   ;;  %s1154_s3 = inlined_call_operand.vmem [shape: f32[16,4], index: 3, kind: input, shape index: {}]   ;;  %s1155_s4 = inlined_call_operand.vmem [shape: f32[16,1], index: 4, kind: input, shape index: {}]   ;;  %s1156_s5 = inlined_call_operand.vmem [shape: f32[32,16], index: 5, kind: input, shape index: {}]   ;;  %s1157_s6 = inlined_call_operand.vmem [shape: f32[32,1], index: 6, kind: input, shape index: {}]   ;;  %s1158_s7 = inlined_call_operand.hbm [shape: f32[16,128], index: 7, kind: output, shape index: {0}]   ;;  %s1159_s8 = inlined_call_operand.hbm [shape: f32[32,32], index: 8, kind: output, shape index: {1}]  }
   0x1   :  { %15 = vsyncpa [#allocation4], 0 }
   0x2   :  { %16 = vsyncpa [#allocation7], 0  ;;  %s955_s27 = smov [#allocation2]   ;;  %s883_s9 = scalar_lea.hbm %s1152_s1, 8192 }
   0x3   :  { %s24_s28 = sshll.u32 %s955_s27, 4  ;;  %p884_p0 = scmp.ne.s32.totalorder %s1152_s1, %s883_s9  ;;  %s25_s28 = int_to_ptr.vmem [resolvable:$true] %s24_s28 }
   0x4   :  { %p887_p1 = scmp.lt.u32.totalorder %s883_s9, %s1152_s1 }
   0x6   :  { %p889_p2 = pnand %p887_p1, %p884_p0 }
   0x8   :  { %892 = shalt.err (!%p889_p2)
}
   0x9   :  { %s893_s14 = scalar_lea.vmem %s25_s28, 8192  ;;  %p898_p4 = scmp.lt.s32.totalorder %s25_s28, %s25_s28 }
   0xa   :  { %p894_p3 = scmp.ne.s32.totalorder %s25_s28, %s893_s14  ;;  %p899_p5 = scmp.lt.s32.totalorder %s893_s14, %s893_s14 }
   0xc   :  { %p900_p6 = por %p899_p5, %p898_p4 }
   0xe   :  { %p901_p7 = pnand %p900_p6, %p894_p3 }
  0x10   :  { %904 = shalt.err (!%p901_p7)
}
  0x11   :  { %s956_s15 = smov 128   ;;  %s957_s16 = smov 8  }
  0x12   :  { %30 = dma.hbm_to_vmem [thread:$0]  %s1152_s1, 8192, %s25_s28, [#allocation3], %s956_s15, %s956_s15, %s957_s16  }
  0x13   :  { %949 = dma.done.wait [#allocation3], 8192  }
  0x14   :  { %950 = vsyncadd [#allocation3], 4294959104  ;;  %v62_v0 = vld [vmem:[#allocation2 + $0x80] sm:$0xff]  ;;  %v63_v1 = vld [vmem:[#allocation2 + $0x88] sm:$0xff]  ;;  %vm270_vm0 = vcmask 31744   ;;  %vm277_vm1 = vcmask 1043456  }
  0x15   :  { %v94_v2 = vld [vmem:[#allocation2 + $0x180] sm:$0xff]  ;;  %v773_v3 = vpack.c.bf16 %v63_v1, %v62_v0  ;;  %v95_v4 = vld [vmem:[#allocation2 + $0x188] sm:$0xff]  ;;  %v64_v11 = vld [vmem:[#allocation2 + $0x90] sm:$0xff]  ;;  %vm479_vm2 = vcmask 130048   ;;  %s959_s28 = smov [#allocation5]  }
  0x16   :  { %v46_v5 = vld [vmem:[#allocation2] sm:$0xff]  ;;  %v47_v6 = vld [vmem:[#allocation2 + $0x8] sm:$0xff]  ;;  %v805_v7 = vpack.c.bf16 %v95_v4, %v94_v2  ;;  %v65_v13 = vld [vmem:[#allocation2 + $0x98] sm:$0xff]  ;;  %s591_s29 = sshll.u32 %s959_s28, 4  ;;  %s592_s29 = int_to_ptr.vmem [resolvable:$true] %s591_s29 }
  0x17   :  { %v775_v8 = vpack.c.bf16 %v47_v6, %v46_v5  ;;  %v78_v9 = vld [vmem:[#allocation2 + $0x100] sm:$0xff]  ;;  %v79_v10 = vld [vmem:[#allocation2 + $0x108] sm:$0xff]  ;;  %774 = vmatprep.subr.bf16.mxu0 %v773_v3  ;;  %v96_v14 = vld [vmem:[#allocation2 + $0x190] sm:$0xff]  ;;  %v777_v16 = vpack.c.bf16 %v65_v13, %v64_v11  ;;  %s905_s30 = scalar_lea.vmem %s592_s29, 256  ;;  %p910_p9 = scmp.lt.s32.totalorder %s592_s29, %s592_s29 }
  0x18   :  { %v807_v12 = vpack.c.bf16 %v79_v10, %v78_v9  ;;  %v97_v15 = vld [vmem:[#allocation2 + $0x198] sm:$0xff]  ;;  %806 = vmatprep.subr.bf16.mxu1 %v805_v7  ;;  %v48_v18 = vld [vmem:[#allocation2 + $0x10] sm:$0xff]  ;;  %v66_v23 = vld [vmem:[#allocation2 + $0xa0] sm:$0xff]  ;;  %p906_p8 = scmp.ne.s32.totalorder %s592_s29, %s905_s30  ;;  %p911_p10 = scmp.lt.s32.totalorder %s905_s30, %s905_s30 }
  0x19   :  { %776 = vmatpush3.bf16.msra.mxu0 %v775_v8  ;;  %v809_v17 = vpack.c.bf16 %v97_v15, %v96_v14  ;;  %v49_v19 = vld [vmem:[#allocation2 + $0x18] sm:$0xff]  ;;  %v80_v20 = vld [vmem:[#allocation2 + $0x110] sm:$0xff]  ;;  %v67_v24 = vld [vmem:[#allocation2 + $0xa8] sm:$0xff] }
  0x1a   :  { %808 = vmatpush3.bf16.msra.mxu1 %v807_v12  ;;  %v779_v21 = vpack.c.bf16 %v49_v19, %v48_v18  ;;  %v81_v22 = vld [vmem:[#allocation2 + $0x118] sm:$0xff]  ;;  %778 = vmatprep.subr.bf16.mxu0 %v777_v16  ;;  %v781_v26 = vpack.c.bf16 %v67_v24, %v66_v23  ;;  %v98_v27 = vld [vmem:[#allocation2 + $0x1a0] sm:$0xff]  ;;  %v99_v28 = vld [vmem:[#allocation2 + $0x1a8] sm:$0xff]  ;;  %p912_p11 = por %p911_p10, %p910_p9 }
  0x1b   :  { %810 = vmatprep.subr.bf16.mxu1 %v809_v17  ;;  %v811_v25 = vpack.c.bf16 %v81_v22, %v80_v20  ;;  %v50_v29 = vld [vmem:[#allocation2 + $0x20] sm:$0xff]  ;;  %v813_v30 = vpack.c.bf16 %v99_v28, %v98_v27  ;;  %v51_v31 = vld [vmem:[#allocation2 + $0x28] sm:$0xff]  ;;  %v68_v35 = vld [vmem:[#allocation2 + $0xb0] sm:$0xff] }
  0x1c   :  { %v82_v32 = vld [vmem:[#allocation2 + $0x120] sm:$0xff]  ;;  %v83_v33 = vld [vmem:[#allocation2 + $0x128] sm:$0xff]  ;;  %v783_v34 = vpack.c.bf16 %v51_v31, %v50_v29  ;;  %v69_v36 = vld [vmem:[#allocation2 + $0xb8] sm:$0xff]  ;;  %p913_p12 = pnand %p912_p11, %p906_p8 }
  0x1d   :  { %780 = vmatpush3.bf16.msra.mxu0 %v779_v21  ;;  %v100_v37 = vld [vmem:[#allocation2 + $0x1b0] sm:$0xff]  ;;  %v815_v38 = vpack.c.bf16 %v83_v33, %v82_v32  ;;  %v785_v39 = vpack.c.bf16 %v69_v36, %v68_v35  ;;  %v101_v40 = vld [vmem:[#allocation2 + $0x1b8] sm:$0xff]  ;;  %v70_v46 = vld [vmem:[#allocation2 + $0xc0] sm:$0xff] }
  0x1e   :  { %812 = vmatpush3.bf16.msra.mxu1 %v811_v25  ;;  %782 = vmatprep.subr.bf16.mxu0 %v781_v26  ;;  %v52_v41 = vld [vmem:[#allocation2 + $0x30] sm:$0xff]  ;;  %v53_v42 = vld [vmem:[#allocation2 + $0x38] sm:$0xff]  ;;  %v817_v43 = vpack.c.bf16 %v101_v40, %v100_v37  ;;  %v71_v47 = vld [vmem:[#allocation2 + $0xc8] sm:$0xff] }
  0x1f   :  { %814 = vmatprep.subr.bf16.mxu1 %v813_v30  ;;  %v84_v44 = vld [vmem:[#allocation2 + $0x130] sm:$0xff]  ;;  %v85_v45 = vld [vmem:[#allocation2 + $0x138] sm:$0xff]  ;;  %v102_v48 = vld [vmem:[#allocation2 + $0x1c0] sm:$0xff]  ;;  %v787_v50 = vpack.c.bf16 %v53_v42, %v52_v41  ;;  %v789_v52 = vpack.c.bf16 %v71_v47, %v70_v46 }
  0x20   :  { %v103_v49 = vld [vmem:[#allocation2 + $0x1c8] sm:$0xff]  ;;  %v819_v51 = vpack.c.bf16 %v85_v45, %v84_v44  ;;  %v54_v53 = vld [vmem:[#allocation2 + $0x40] sm:$0xff]  ;;  %v72_v58 = vld [vmem:[#allocation2 + $0xd0] sm:$0xff] }
  0x21   :  { %784 = vmatpush3.bf16.msra.mxu0 %v783_v34  ;;  %v55_v54 = vld [vmem:[#allocation2 + $0x48] sm:$0xff]  ;;  %v86_v55 = vld [vmem:[#allocation2 + $0x140] sm:$0xff]  ;;  %v821_v56 = vpack.c.bf16 %v103_v49, %v102_v48  ;;  %v73_v59 = vld [vmem:[#allocation2 + $0xd8] sm:$0xff] }
  0x22   :  { %816 = vmatpush3.bf16.msra.mxu1 %v815_v38  ;;  %786 = vmatprep.subr.bf16.mxu0 %v785_v39  ;;  %v87_v57 = vld [vmem:[#allocation2 + $0x148] sm:$0xff]  ;;  %v104_v60 = vld [vmem:[#allocation2 + $0x1d0] sm:$0xff]  ;;  %v105_v61 = vld [vmem:[#allocation2 + $0x1d8] sm:$0xff]  ;;  %v791_v62 = vpack.c.bf16 %v55_v54, %v54_v53  ;;  %v793_v0 = vpack.c.bf16 %v73_v59, %v72_v58  ;;  %v958_v38 = vmov 0  }
  0x23   :  { %818 = vmatprep.subr.bf16.mxu1 %v817_v43  ;;  %v823_v63 = vpack.c.bf16 %v87_v57, %v86_v55  ;;  %v56_v1 = vld [vmem:[#allocation2 + $0x50] sm:$0xff]  ;;  %v57_v2 = vld [vmem:[#allocation2 + $0x58] sm:$0xff]  ;;  %v825_v4 = vpack.c.bf16 %v105_v61, %v104_v60  ;;  %v74_v6 = vld [vmem:[#allocation2 + $0xe0] sm:$0xff]  ;;  %879 = vset.pattern.permute.xlu0 %v958_v38 }
  0x24   :  { %v88_v3 = vld [vmem:[#allocation2 + $0x150] sm:$0xff]  ;;  %v89_v5 = vld [vmem:[#allocation2 + $0x158] sm:$0xff]  ;;  %v75_v7 = vld [vmem:[#allocation2 + $0xe8] sm:$0xff]  ;;  %v795_v10 = vpack.c.bf16 %v57_v2, %v56_v1  ;;  %880 = vset.pattern.permute.xlu1 %v958_v38 }
  0x25   :  { %788 = vmatpush3.bf16.msra.mxu0 %v787_v50  ;;  %v106_v8 = vld [vmem:[#allocation2 + $0x1e0] sm:$0xff]  ;;  %v107_v9 = vld [vmem:[#allocation2 + $0x1e8] sm:$0xff]  ;;  %v827_v13 = vpack.c.bf16 %v89_v5, %v88_v3  ;;  %v797_v14 = vpack.c.bf16 %v75_v7, %v74_v6  ;;  %v76_v20 = vld [vmem:[#allocation2 + $0xf0] sm:$0xff] }
  0x26   :  { %820 = vmatpush3.bf16.msra.mxu1 %v819_v51  ;;  %790 = vmatprep.subr.bf16.mxu0 %v789_v52  ;;  %v58_v11 = vld [vmem:[#allocation2 + $0x60] sm:$0xff]  ;;  %v59_v12 = vld [vmem:[#allocation2 + $0x68] sm:$0xff]  ;;  %v829_v18 = vpack.c.bf16 %v107_v9, %v106_v8  ;;  %v77_v21 = vld [vmem:[#allocation2 + $0xf8] sm:$0xff] }
  0x27   :  { %822 = vmatprep.subr.bf16.mxu1 %v821_v56  ;;  %v90_v15 = vld [vmem:[#allocation2 + $0x160] sm:$0xff]  ;;  %v45_v17 = vld [vmem:[%s1151_s0 + $0x8] sm:$0xff]  ;;  %v108_v24 = vld [vmem:[#allocation2 + $0x1f0] sm:$0xff]  ;;  %v799_v26 = vpack.c.bf16 %v59_v12, %v58_v11  ;;  %v801_v28 = vpack.c.bf16 %v77_v21, %v76_v20 }
  0x28   :  { %v44_v16 = vld [vmem:[%s1151_s0] sm:$0xff]  ;;  %v91_v19 = vld [vmem:[#allocation2 + $0x168] sm:$0xff]  ;;  %v113_v23 = vcombine.high %v45_v17, %v45_v17  ;;  %v109_v25 = vld [vmem:[#allocation2 + $0x1f8] sm:$0xff] }
  0x29   :  { %792 = vmatpush3.bf16.msra.mxu0 %v791_v62  ;;  %v112_v22 = vcombine.high %v44_v16, %v44_v16  ;;  %v831_v27 = vpack.c.bf16 %v91_v19, %v90_v15  ;;  %v60_v29 = vld [vmem:[#allocation2 + $0x70] sm:$0xff]  ;;  %v61_v30 = vld [vmem:[#allocation2 + $0x78] sm:$0xff]  ;;  %v833_v31 = vpack.c.bf16 %v109_v25, %v108_v24  ;;  %v256_v36 = vld [vmem:[%s1154_s3] sm:$0xff] }
  0x2a   :  { %824 = vmatpush3.bf16.msra.mxu1 %v823_v63  ;;  %794 = vmatprep.subr.bf16.mxu0 %v793_v0  ;;  %v92_v32 = vld [vmem:[#allocation2 + $0x170] sm:$0xff]  ;;  %v93_v33 = vld [vmem:[#allocation2 + $0x178] sm:$0xff]  ;;  %v803_v34 = vpack.c.bf16 %v61_v30, %v60_v29  ;;  %v258_v37 = vld [vmem:[%s1155_s4] sm:$0xff] }
  0x2b   :  { %826 = vmatprep.subr.bf16.mxu1 %v825_v4  ;;  %180 = vmatprep.mubr.f32.mxu0 %v112_v22  ;;  %v835_v35 = vpack.c.bf16 %v93_v33, %v92_v32  ;;  %v360_v39 = vld [vmem:[%s1153_s2] sm:$0xff]  ;;  %v361_v40 = vld [vmem:[%s1153_s2 + $0x8] sm:$0xff]  ;;  %v362_v41 = vld [vmem:[%s1153_s2 + $0x10] sm:$0xff] }
  0x2c   :  { %250 = vmatprep.mubr.f32.mxu1 %v113_v23  ;;  %262 = vperm.xlu0 %879, %v258_v37   ;;  %v837_v42 = vpack.c.bf16 %v361_v40, %v360_v39  ;;  %v363_v43 = vld [vmem:[%s1153_s2 + $0x18] sm:$0xff]  ;;  %v259_v44 = vld [vmem:[%s1155_s4 + $0x8] sm:$0xff]  ;;  %v364_v46 = vld [vmem:[%s1153_s2 + $0x20] sm:$0xff] }
  0x2d   :  { %796 = vmatpush3.bf16.msra.mxu0 %v795_v10  ;;  %v841_v45 = vpack.c.bf16 %v363_v43, %v362_v41  ;;  %v365_v47 = vld [vmem:[%s1153_s2 + $0x28] sm:$0xff]  ;;  %v457_v49 = vld [vmem:[%s1157_s6 + $0x10] sm:$0xff]  ;;  %v367_v51 = vld [vmem:[%s1153_s2 + $0x38] sm:$0xff] }
  0x2e   :  { %828 = vmatpush3.bf16.msra.mxu1 %v827_v13  ;;  %798 = vmatprep.subr.bf16.mxu0 %v797_v14  ;;  %v845_v48 = vpack.c.bf16 %v365_v47, %v364_v46  ;;  %v366_v50 = vld [vmem:[%s1153_s2 + $0x30] sm:$0xff]  ;;  %v368_v53 = vld [vmem:[%s1153_s2 + $0x40] sm:$0xff]  ;;  %v369_v54 = vld [vmem:[%s1153_s2 + $0x48] sm:$0xff] }
  0x2f   :  { %830 = vmatprep.subr.bf16.mxu1 %v829_v18  ;;  %v849_v52 = vpack.c.bf16 %v367_v51, %v366_v50  ;;  %v853_v55 = vpack.c.bf16 %v369_v54, %v368_v53  ;;  %v370_v56 = vld [vmem:[%s1153_s2 + $0x50] sm:$0xff]  ;;  %v371_v57 = vld [vmem:[%s1153_s2 + $0x58] sm:$0xff]  ;;  %v372_v59 = vld [vmem:[%s1153_s2 + $0x60] sm:$0xff] }
  0x30   :  { %267 = vperm.xlu0 %879, %v259_v44   ;;  %v857_v58 = vpack.c.bf16 %v371_v57, %v370_v56  ;;  %v373_v60 = vld [vmem:[%s1153_s2 + $0x68] sm:$0xff]  ;;  %v374_v6 = vld [vmem:[%s1153_s2 + $0x70] sm:$0xff]  ;;  %v375_v7 = vld [vmem:[%s1153_s2 + $0x78] sm:$0xff] }
  0x31   :  { %800 = vmatpush3.bf16.msra.mxu0 %v799_v26  ;;  %v861_v61 = vpack.c.bf16 %v373_v60, %v372_v59  ;;  %v257_v5 = vld [vmem:[%s1154_s3 + $0x8] sm:$0xff]  ;;  %v865_v8 = vpack.c.bf16 %v375_v7, %v374_v6  ;;  %v455_v18 = vld [vmem:[%s1157_s6] sm:$0xff]  ;;  %v458_v20 = vld [vmem:[%s1157_s6 + $0x18] sm:$0xff] }
  0x32   :  { %832 = vmatpush3.bf16.msra.mxu1 %v831_v27  ;;  %802 = vmatprep.subr.bf16.mxu0 %v801_v28  ;;  %v456_v19 = vld [vmem:[%s1157_s6 + $0x8] sm:$0xff]  ;;  %v453_v25 = vld [vmem:[%s1156_s5 + $0x10] sm:$0xff]  ;;  %v454_v26 = vld [vmem:[%s1156_s5 + $0x18] sm:$0xff] }
  0x33   :  { %834 = vmatprep.subr.bf16.mxu1 %v833_v31  ;;  %461 = vperm.xlu1 %880, %v455_v18   ;;  %v452_v24 = vld [vmem:[%s1156_s5 + $0x8] sm:$0xff] }
  0x34   :  { %471 = vperm.xlu0 %879, %v457_v49  }
  0x35   :  { %804 = vmatpush3.bf16.msra.mxu0 %v803_v34 }
  0x36   :  { %836 = vmatpush3.bf16.msra.mxu1 %v835_v35 }
  0x37   :  { %838 = vmatprep.subr.bf16.mxu1 %v837_v42  ;;  %466 = vperm.xlu1 %880, %v456_v19  }
  0x38   :  { %181 = vmatmul.mubr.f32.vlgmr.msra.gmra.mrb[0].mxu0 %v44_v16 }
  0x39   :  { %251 = vmatmul.mubr.f32.vlgmr.msra.gmra.mrb[0].mxu1 %v45_v17  ;;  %725 = vmatprep.mubr.msk.f32.mxu0 %vm270_vm0, %v256_v36  ;;  %v451_v17 = vld [vmem:[%s1156_s5] sm:$0xff] }
  0x3a   :  { %840 = vmatpush3.bf16.msra.mxu1 %v837_v42 }
  0x3b   :  { %842 = vmatprep.subr.bf16.mxu1 %v841_v45  ;;  %476 = vperm.xlu1 %880, %v458_v20  }
  0x3e   :  { %844 = vmatpush3.bf16.msra.mxu1 %v841_v45 }
  0x3f   :  { %846 = vmatprep.subr.bf16.mxu1 %v845_v48 }
  0x42   :  { %848 = vmatpush3.bf16.msra.mxu1 %v845_v48 }
  0x43   :  { %850 = vmatprep.subr.bf16.mxu1 %v849_v52 }
  0x46   :  { %852 = vmatpush3.bf16.msra.mxu1 %v849_v52 }
  0x47   :  { %854 = vmatprep.subr.bf16.mxu1 %v853_v55 }
  0x4a   :  { %856 = vmatpush3.bf16.msra.mxu1 %v853_v55 }
  0x4b   :  { %858 = vmatprep.subr.bf16.mxu1 %v857_v58 }
  0x4e   :  { %860 = vmatpush3.bf16.msra.mxu1 %v857_v58 }
  0x4f   :  { %862 = vmatprep.subr.bf16.mxu1 %v861_v61 }
  0x52   :  { %864 = vmatpush3.bf16.msra.mxu1 %v861_v61 }
  0x53   :  { %866 = vmatprep.subr.bf16.mxu1 %v865_v8 }
  0x56   :  { %868 = vmatpush3.bf16.msra.mxu1 %v865_v8 }
  0xab   :  { %v263_v9 = vpop.permute.xlu0 %262 }
  0xaf   :  { %v268_v10 = vpop.permute.xlu0 %267 }
 0x10b   :  { %v658_v62 = vpop.f32.mrb[0].mxu0 }
 0x10c   :  { %v693_v63 = vpop.f32.mrb[0].mxu1  ;;  %v659_v0 = vpop.f32.mrb[1].mxu0 }
 0x10d   :  { %v660_v1 = vadd.f32 %v659_v0, %v658_v62  ;;  %v694_v2 = vpop.f32.mrb[1].mxu1 }
 0x10e   :  { %v695_v3 = vadd.f32 %v694_v2, %v693_v63 }
 0x110   :  { %v253_v4 = vadd.f32 %v695_v3, %v660_v1 }
 0x112   :  { %723 = vmatprep.subr.msk.mxu0 %vm277_vm1, %v253_v4 }
 0x113   :  { %724 = vmatpush3.msk.msra.mxu0 %vm277_vm1, %v253_v4 }
 0x114   :  { %726 = vmatmul.mubr.msk.f32.vlgmr.msra.gmra.mrb[2].mxu0 %vm270_vm0, %v257_v5 }
 0x115   :  { %767 = vmatprep.mubr.msk.f32.mxu0 %vm479_vm2, %v451_v17 }
 0x1e7   :  { %v727_v11 = vpop.f32.mrb[2].mxu0 }
 0x1e8   :  { %v353_v12 = vadd.f32 %v727_v11, %v268_v10  ;;  %v347_v13 = vpop.f32.mrb[3].mxu0 }
 0x1e9   :  { %v348_v14 = vadd.f32 %v347_v13, %v263_v9 }
 0x1ea   :  { %v357_v15 = vmax.f32 %v353_v12, 0.0 }
 0x1eb   :  { %v356_v16 = vmax.f32 %v348_v14, 0.0 }
 0x1ec   :  { %359 = vst [vmem:[#allocation5 + $0x8] sm:$0xff] %v357_v15 }
 0x1ed   :  { %358 = vst [vmem:[#allocation5] sm:$0xff] %v356_v16  ;;  %760 = vmatprep.mubr.f32.mxu1 %v356_v16 }
 0x1ee   :  { %761 = vmatmul.mubr.f32.vlgmr.msra.gmra.mrb[2].mxu1 %v357_v15 }
 0x2c1   :  { %v762_v21 = vpop.f32.mrb[2].mxu1 }
 0x2c2   :  { %v442_v22 = vpop.f32.mrb[3].mxu1 }
 0x2c3   :  { %v869_v23 = vpack.c.bf16 %v762_v21, %v442_v22 }
 0x2c5   :  { %870 = vmatprep.subr.bf16.mxu0 %v869_v23 }
 0x2c6   :  { %872 = vmatpush3.bf16.msra.mxu0 %v869_v23 }
 0x2c9   :  { %768 = vmatmul.mubr.msk.f32.vlgmr.msra.gmra.mrb[4].mxu0 %vm479_vm2, %v452_v24 }
 0x2ca   :  { %770 = vmatprep.mubr.msk.f32.mxu0 %vm479_vm2, %v453_v25 }
 0x2cd   :  { %771 = vmatmul.mubr.msk.f32.gmra.mrb[6].mxu0 %vm479_vm2, %v454_v26 }
 0x2ce   :  { %916 = shalt.err (!%p913_p12)
}
 0x2cf   :  { %s917_s11 = scalar_lea.hbm %s1158_s7, 256 }
 0x2d0   :  { %p918_p13 = scmp.ne.s32.totalorder %s1158_s7, %s917_s11  ;;  %p921_p0 = scmp.lt.u32.totalorder %s917_s11, %s1158_s7 }
 0x2d2   :  { %p923_p1 = pnand %p921_p0, %p918_p13 }
 0x2d4   :  { %926 = shalt.err (!%p923_p1)
}
 0x2d5   :  { %597 = dma.vmem_to_hbm [thread:$0]  %s592_s29, 256, %s1158_s7, [#allocation4], %s956_s15, %s956_s15, %s957_s16   ;;  %v462_v27 = vpop.permute.xlu1 %461  ;;  %vm581_vm3 = vcmask 261120   ;;  %v472_v37 = vpop.permute.xlu0 %471 }
 0x2d6   :  { %s960_s1 = smov [#allocation6]  }
 0x2d7   :  { %s603_s3 = sshll.u32 %s960_s1, 4  ;;  %s604_s3 = int_to_ptr.vmem [resolvable:$true] %s603_s3 }
 0x2d8   :  { %s927_s7 = scalar_lea.vmem %s604_s3, 512  ;;  %p932_p3 = scmp.lt.s32.totalorder %s604_s3, %s604_s3 }
 0x2d9   :  { %v467_v28 = vpop.permute.xlu1 %466  ;;  %p928_p2 = scmp.ne.s32.totalorder %s604_s3, %s927_s7  ;;  %p933_p4 = scmp.lt.s32.totalorder %s927_s7, %s927_s7 }
 0x2db   :  { %p934_p5 = por %p933_p4, %p932_p3 }
 0x2dd   :  { %v477_v34 = vpop.permute.xlu1 %476  ;;  %p935_p6 = pnand %p934_p5, %p928_p2 }
 0x39c   :  { %v769_v29 = vpop.f32.mrb[4].mxu0 }
 0x39d   :  { %v564_v30 = vadd.f32 %v769_v29, %v467_v28  ;;  %v558_v31 = vpop.f32.mrb[5].mxu0 }
 0x39e   :  { %v559_v32 = vadd.f32 %v558_v31, %v462_v27 }
 0x39f   :  { %v578_v33 = vmax.f32 %v564_v30, 0.0 }
 0x3a0   :  { %v577_v35 = vmax.f32 %v559_v32, 0.0  ;;  %v772_v36 = vpop.f32.mrb[6].mxu0 }
 0x3a1   :  { %583 = vst.msk [vmem:[#allocation6 + $0x8] sm:$0xff] %vm581_vm3, %v578_v33  ;;  %v574_v38 = vadd.f32 %v772_v36, %v477_v34  ;;  %v568_v39 = vpop.f32.mrb[7].mxu0 }
 0x3a2   :  { %582 = vst.msk [vmem:[#allocation6] sm:$0xff] %vm581_vm3, %v577_v35  ;;  %v569_v40 = vadd.f32 %v568_v39, %v472_v37 }
 0x3a3   :  { %v580_v41 = vmax.f32 %v574_v38, 0.0 }
 0x3a4   :  { %v579_v42 = vmax.f32 %v569_v40, 0.0 }
 0x3a5   :  { %585 = vst.msk [vmem:[#allocation6 + $0x18] sm:$0xff] %vm581_vm3, %v580_v41 }
 0x3a6   :  { %584 = vst.msk [vmem:[#allocation6 + $0x10] sm:$0xff] %vm581_vm3, %v579_v42 }
 0x3a7   :  { %938 = shalt.err (!%p935_p6)
}
 0x3a8   :  { %s939_s20 = scalar_lea.hbm %s1159_s8, 512 }
 0x3a9   :  { %p940_p7 = scmp.ne.s32.totalorder %s1159_s8, %s939_s20  ;;  %p943_p8 = scmp.lt.u32.totalorder %s939_s20, %s1159_s8 }
 0x3ab   :  { %p945_p9 = pnand %p943_p8, %p940_p7 }
 0x3ad   :  { %948 = shalt.err (!%p945_p9)
}
 0x3ae   :  { %609 = dma.vmem_to_hbm [thread:$0]  %s604_s3, 512, %s1159_s8, [#allocation7], %s956_s15, %s956_s15, %s957_s16  }
 0x3af   :  { %951 = dma.done.wait [#allocation4], 256  }
 0x3b0   :  { %952 = vsyncadd [#allocation4], 4294967040 }
 0x3b1   :  { %953 = dma.done.wait [#allocation7], 512  }
 0x3b2   :  { %954 = vsyncadd [#allocation7], 4294966784 }
 0x3b3   :  { %616 = vsyncpa [#allocation3], 1 }
 0x3b4   :  { %617 = vsyncpa [#allocation4], 1 }
 0x3b5   :  { %618 = vsyncpa [#allocation7], 1 }

</bundles_post_ra>
